<compile_context>
chip_gen: v6e
topology: v6e:2x2x1
jax: 0.10.0
libtpu: 0.0.40
codegen_flags: <defaults>
</compile_context>

<pallas_src>
import math
import functools

import jax
import jax.numpy as jnp
from jax.experimental import pallas as pl
from jax.experimental.pallas import tpu as pltpu

EPS = 1e-5
LANE = 128


def _ru(x, m):
    return ((x + m - 1) // m) * m


# ----------------------------------------------------------------------------
# Pallas kernel 1: tiled matmul (bf16 in, f32 accum) with fused per-column
# scale/bias, optional residual add and optional ReLU in the epilogue.
# ----------------------------------------------------------------------------
def _matmul_kernel(*refs, relu, has_res):
    if has_res:
        a_ref, b_ref, s_ref, bias_ref, r_ref, o_ref, acc_ref = refs
    else:
        a_ref, b_ref, s_ref, bias_ref, o_ref, acc_ref = refs
        r_ref = None
    k = pl.program_id(2)

    @pl.when(k == 0)
    def _():
        acc_ref[...] = jnp.zeros_like(acc_ref)

    acc_ref[...] += jnp.dot(a_ref[...], b_ref[...],
                            preferred_element_type=jnp.float32)

    @pl.when(k == pl.num_programs(2) - 1)
    def _():
        out = acc_ref[...] * s_ref[...] + bias_ref[...]
        if has_res:
            out = out + r_ref[...].astype(jnp.float32)
        if relu:
            out = jnp.maximum(out, 0.0)
        o_ref[...] = out.astype(o_ref.dtype)


@functools.partial(jax.jit, static_argnames=("relu", "out_dtype"))
def pallas_matmul(a, b, scale, bias, residual=None, relu=False,
                  out_dtype=jnp.bfloat16):
    """act((a @ b) * scale[N] + bias[N] [+ residual]); returns (M, Np)."""
    M, K = a.shape
    K2, N = b.shape
    assert K == K2
    Kp, Np = _ru(K, LANE), _ru(N, LANE)
    TK = 256 if Kp % 256 == 0 else 128
    TN = 256 if Np % 256 == 0 else 128
    Mp8 = _ru(M, 8)
    if Mp8 <= 512:
        TM = Mp8            # single M tile, no padding waste for small M
    elif Mp8 % 512 == 0:
        TM = 512
    elif Mp8 % 256 == 0:
        TM = 256
    else:
        TM = 128
    Mp = _ru(Mp8, TM)

    a_p = jnp.pad(a.astype(jnp.bfloat16), ((0, Mp - M), (0, Kp - K)))
    b_p = jnp.pad(b.astype(jnp.bfloat16), ((0, Kp - K), (0, Np - N)))
    s_p = jnp.pad(scale.astype(jnp.float32), (0, Np - N)).reshape(1, Np)
    bi_p = jnp.pad(bias.astype(jnp.float32), (0, Np - N)).reshape(1, Np)

    inputs = [a_p, b_p, s_p, bi_p]
    in_specs = [
        pl.BlockSpec((TM, TK), lambda m, n, k: (m, k)),
        pl.BlockSpec((TK, TN), lambda m, n, k: (k, n)),
        pl.BlockSpec((1, TN), lambda m, n, k: (0, n)),
        pl.BlockSpec((1, TN), lambda m, n, k: (0, n)),
    ]
    has_res = residual is not None
    if has_res:
        Mr, Nr = residual.shape
        r_p = jnp.pad(residual.astype(jnp.bfloat16),
                      ((0, Mp - Mr), (0, Np - Nr)))
        inputs.append(r_p)
        # index_map ignores k (innermost) -> fetched once per (m, n)
        in_specs.append(pl.BlockSpec((TM, TN), lambda m, n, k: (m, n)))

    grid = (Mp // TM, Np // TN, Kp // TK)
    out = pl.pallas_call(
        functools.partial(_matmul_kernel, relu=relu, has_res=has_res),
        out_shape=jax.ShapeDtypeStruct((Mp, Np), out_dtype),
        grid_spec=pltpu.PrefetchScalarGridSpec(
            num_scalar_prefetch=0,
            grid=grid,
            in_specs=in_specs,
            out_specs=pl.BlockSpec((TM, TN), lambda m, n, k: (m, n)),
            scratch_shapes=[pltpu.VMEM((TM, TN), jnp.float32)],
        ),
        compiler_params=pltpu.CompilerParams(
            dimension_semantics=("parallel", "parallel", "arbitrary")),
    )(*inputs)
    return out[:M]


# ----------------------------------------------------------------------------
# Pallas kernel 2: depthwise 3x3 conv.  Taps are formed in-kernel from a
# spatially padded NHWC slab (no 9x im2col in HBM); fused pre-ReLU + BN.
# ----------------------------------------------------------------------------
def _dw_kernel(x_ref, w_ref, s_ref, b_ref, o_ref, *, pre_relu, d, ho, wo):
    x = x_ref[0]                                   # (TH_in, Wp, TC) bf16
    if pre_relu:
        x = jnp.maximum(x, 0)
    tc = x_ref.shape[-1]
    acc = jnp.zeros((ho, wo, tc), jnp.float32)
    for kh in range(3):
        for kw in range(3):
            xt = x[kh * d:kh * d + ho, kw * d:kw * d + wo, :]
            acc = acc + xt.astype(jnp.float32) * w_ref[kh * 3 + kw, :]
    out = acc * s_ref[0, :] + b_ref[0, :]
    o_ref[0] = out.astype(o_ref.dtype)


@functools.partial(jax.jit, static_argnames=("pre_relu", "dilation"))
def _dw_slab(xp, w9, scale, bias, pre_relu, dilation):
    """xp: (N, TH_in, Wp, C) padded bf16 slab -> dense stride-1 dw conv."""
    N, TH_in, Wp, C = xp.shape
    d = dilation
    ho, wo = TH_in - 2 * d, Wp - 2 * d
    TC = LANE
    grid = (N, C // TC)
    return pl.pallas_call(
        functools.partial(_dw_kernel, pre_relu=pre_relu, d=d, ho=ho, wo=wo),
        out_shape=jax.ShapeDtypeStruct((N, ho, wo, C), jnp.bfloat16),
        grid_spec=pltpu.PrefetchScalarGridSpec(
            num_scalar_prefetch=0,
            grid=grid,
            in_specs=[
                pl.BlockSpec((1, TH_in, Wp, TC), lambda n, c: (n, 0, 0, c)),
                pl.BlockSpec((9, TC), lambda n, c: (0, c)),
                pl.BlockSpec((1, TC), lambda n, c: (0, c)),
                pl.BlockSpec((1, TC), lambda n, c: (0, c)),
            ],
            out_specs=pl.BlockSpec((1, ho, wo, TC), lambda n, c: (n, 0, 0, c)),
        ),
        compiler_params=pltpu.CompilerParams(
            dimension_semantics=("parallel", "parallel"),
            vmem_limit_bytes=32 * 1024 * 1024),
    )(xp, w9, scale.reshape(1, -1), bias.reshape(1, -1))


_DW_MAX_ROWS = 48       # bound per-call output rows so VMEM stays fixed


def pallas_depthwise(xp, w9, scale, bias, pre_relu, dilation):
    """Dense (stride-1) 3x3 depthwise conv + fused BN on padded NHWC input."""
    N, Hp, Wp, C = xp.shape
    d = dilation
    Ho = Hp - 2 * d
    if Ho <= _DW_MAX_ROWS:
        return _dw_slab(xp, w9, scale, bias, pre_relu=pre_relu, dilation=d)
    chunks = []
    r = 0
    while r < Ho:
        rows = min(_DW_MAX_ROWS, Ho - r)
        slab = jax.lax.slice_in_dim(xp, r, r + rows + 2 * d, axis=1)
        chunks.append(_dw_slab(slab, w9, scale, bias,
                               pre_relu=pre_relu, dilation=d))
        r += rows
    return jnp.concatenate(chunks, axis=1)


# ----------------------------------------------------------------------------
# Plain-JAX glue: patch extraction for the two 3x3 stem convs (im2col)
# ----------------------------------------------------------------------------
def _extract_patches(x, k, stride, dilation, pad_beg, pad_end):
    """x: [N,H,W,C] -> [N,Ho,Wo,k*k,C]."""
    N, H, W, C = x.shape
    xp = jnp.pad(x, ((0, 0), (pad_beg, pad_end), (pad_beg, pad_end), (0, 0)))
    Hp = H + pad_beg + pad_end
    Wp = W + pad_beg + pad_end
    eff = (k - 1) * dilation + 1
    Ho = (Hp - eff) // stride + 1
    Wo = (Wp - eff) // stride + 1
    taps = []
    for kh in range(k):
        for kw in range(k):
            taps.append(
                xp[:,
                   kh * dilation: kh * dilation + (Ho - 1) * stride + 1: stride,
                   kw * dilation: kw * dilation + (Wo - 1) * stride + 1: stride,
                   :])
    return jnp.stack(taps, axis=3)


# ----------------------------------------------------------------------------
# Layer wrappers
# ----------------------------------------------------------------------------
def conv3x3_bn(x, w_hwio, stride, pad, scale, bias, relu):
    """Regular 3x3 conv (symmetric padding) + fused BN (+ReLU)."""
    patches = _extract_patches(x, 3, stride, 1, pad, pad)   # [N,Ho,Wo,9,Cin]
    N, Ho, Wo, T, C = patches.shape
    a = patches.reshape(N * Ho * Wo, T * C)
    wmat = w_hwio.reshape(T * C, -1)
    y = pallas_matmul(a, wmat, scale, bias, relu=relu)
    return y.reshape(N, Ho, Wo, -1)


def sepconv_bn(x, p, pre_relu, post_relu=False, residual=None):
    """fixed_padding -> depthwise(+internal BN) -> pointwise(+following BN)."""
    N, H, W, C = x.shape
    d, s = p['dilation'], p['stride']
    xp = jnp.pad(x, ((0, 0), (d, d), (d, d), (0, 0)))       # fixed_padding
    y = pallas_depthwise(xp, p['dw_w'], p['dw_s'], p['dw_b'], pre_relu, d)
    if s != 1:
        y = y[:, ::s, ::s, :]                               # stride subsample
    Nb, Ho, Wo, _ = y.shape
    out = pallas_matmul(y.reshape(Nb * Ho * Wo, C), p['pw_w'],
                        p['out_s'], p['out_b'], residual=residual,
                        relu=post_relu)
    return out.reshape(Nb, Ho, Wo, -1)


def block_forward(x, bp):
    # residual path first, so it can be fused into the last pointwise matmul
    if bp['skip'] is not None:
        sk = bp['skip']
        xs = x[:, ::sk['stride'], ::sk['stride'], :]
        res = pallas_matmul(xs.reshape(-1, xs.shape[-1]),
                            sk['w'], sk['s'], sk['b'])
    else:
        res = x.reshape(-1, x.shape[-1])
    out = x
    units = bp['units']
    for u in units[:-1]:
        out = sepconv_bn(out, u, pre_relu=u['pre_relu'])
    out = sepconv_bn(out, units[-1], pre_relu=units[-1]['pre_relu'],
                     residual=res)
    return out


# ----------------------------------------------------------------------------
# Parameter construction (deterministic, mirrors Xception65._init_weight).
# All channel dims are padded to multiples of 128 with zeros at build time.
# ----------------------------------------------------------------------------
class ParamGen:
    def __init__(self, seed=0):
        self.key = jax.random.PRNGKey(seed)

    def _next(self):
        self.key, sub = jax.random.split(self.key)
        return sub

    def conv(self, shape, n):
        # nn.Conv2d: weight ~ N(0, sqrt(2/n)), n = kh*kw*out_channels
        return jax.random.normal(self._next(), shape, jnp.float32) * \
            jnp.float32(math.sqrt(2.0 / n))

    def uniform(self, shape, bound):
        return jax.random.uniform(self._next(), shape, jnp.float32,
                                  -bound, bound)


def bn_fold(c, cp):
    # inference-mode BN with gamma=1, beta=0, mean=0, var=1 (module init);
    # padded ghost channels get scale=0, bias=0 so they stay exactly zero.
    scale = jnp.full((c,), 1.0 / math.sqrt(1.0 + EPS), jnp.float32)
    return jnp.pad(scale, (0, cp - c)), jnp.zeros((cp,), jnp.float32)


def make_unit(pg, pre_relu, cin, cout, stride, dilation):
    cin_p, cout_p = _ru(cin, LANE), _ru(cout, LANE)
    dw_w = jnp.pad(pg.conv((3, 3, cin), 9 * cin).reshape(9, cin),
                   ((0, 0), (0, cin_p - cin)))                      # f32
    dw_s, dw_b = bn_fold(cin, cin_p)                                # dw BN
    pw_w = jnp.pad(pg.conv((cin, cout), cout),
                   ((0, cin_p - cin), (0, cout_p - cout))).astype(jnp.bfloat16)
    out_s, out_b = bn_fold(cout, cout_p)                            # outer BN
    return dict(pre_relu=pre_relu, stride=stride, dilation=dilation,
                dw_w=dw_w, dw_s=dw_s, dw_b=dw_b,
                pw_w=pw_w, out_s=out_s, out_b=out_b)


def block_units(inplanes, planes, reps, stride, dilation,
                start_with_relu, grow_first, is_last):
    units = []
    filters = inplanes
    if grow_first:
        units.append((start_with_relu, inplanes, planes, 1, dilation))
        filters = planes
    for _ in range(reps - 1):
        units.append((grow_first or start_with_relu, filters, filters, 1,
                      dilation))
    if not grow_first:
        units.append((True, inplanes, planes, 1, dilation))
    if stride != 1:
        units.append((True, planes, planes, 2, 1))
    elif is_last:
        units.append((True, planes, planes, 1, dilation))
    return units


def make_block(pg, inplanes, planes, reps, stride=1, dilation=1,
               start_with_relu=True, grow_first=True, is_last=False):
    units = [make_unit(pg, pr, ci, co, s, d)
             for (pr, ci, co, s, d) in block_units(
                 inplanes, planes, reps, stride, dilation,
                 start_with_relu, grow_first, is_last)]
    if planes != inplanes or stride != 1:
        in_p, out_p = _ru(inplanes, LANE), _ru(planes, LANE)
        skip_w = jnp.pad(pg.conv((inplanes, planes), planes),      # 1x1: n=planes
                         ((0, in_p - inplanes),
                          (0, out_p - planes))).astype(jnp.bfloat16)
        skip_s, skip_b = bn_fold(planes, out_p)
        skip = dict(w=skip_w, s=skip_s, b=skip_b, stride=stride)
    else:
        skip = None
    return dict(units=units, skip=skip)


def build_params(output_stride=32, seed=0):
    assert output_stride == 32
    entry_block3_stride = 2
    middle_block_dilation = 1
    exit_block20_stride = 2
    exit_block_dilations = (1, 1)

    pg = ParamGen(seed)
    P = {}
    P['conv1_w'] = jnp.pad(pg.conv((3, 3, 3, 32), 9 * 32),
                           ((0, 0), (0, 0), (0, 0), (0, 96))).astype(jnp.bfloat16)
    P['bn1'] = bn_fold(32, 128)
    P['conv2_w'] = jnp.pad(pg.conv((3, 3, 32, 64), 9 * 64),
                           ((0, 0), (0, 0), (0, 96), (0, 64))).astype(jnp.bfloat16)
    P['bn2'] = bn_fold(64, 128)
    P['block1'] = make_block(pg, 64, 128, 2, stride=2, start_with_relu=False)
    P['block2'] = make_block(pg, 128, 256, 2, stride=2, start_with_relu=False,
                             grow_first=True)
    P['block3'] = make_block(pg, 256, 728, 2, stride=entry_block3_stride,
                             start_with_relu=True, grow_first=True,
                             is_last=True)
    P['mid'] = [make_block(pg, 728, 728, 3, stride=1,
                           dilation=middle_block_dilation,
                           start_with_relu=True, grow_first=True)
                for _ in range(16)]
    P['block20'] = make_block(pg, 728, 1024, 2, stride=exit_block20_stride,
                              dilation=exit_block_dilations[0],
                              start_with_relu=True, grow_first=False,
                              is_last=True)
    # exit separable convs: the "out" BN of each unit is bn3/bn4/bn5
    P['conv3'] = make_unit(pg, False, 1024, 1536, 1, exit_block_dilations[1])
    P['conv4'] = make_unit(pg, False, 1536, 1536, 1, exit_block_dilations[1])
    P['conv5'] = make_unit(pg, False, 1536, 2048, 1, exit_block_dilations[1])
    # fc (nn.Linear default-style uniform init; not touched by _init_weight)
    bound = 1.0 / math.sqrt(2048.0)
    P['fc_w'] = jnp.pad(pg.uniform((2048, 1000), bound),
                        ((0, 0), (0, 24))).astype(jnp.bfloat16)
    P['fc_b'] = jnp.pad(pg.uniform((1000,), bound), (0, 24))
    return P


# ----------------------------------------------------------------------------
# Full forward pass
# ----------------------------------------------------------------------------
def xception65_forward(x_nchw, P):
    x = jnp.transpose(x_nchw, (0, 2, 3, 1)).astype(jnp.bfloat16)   # NHWC bf16
    # conv1 + bn1 + relu  /  conv2 + bn2 + relu  (BN/ReLU fused in epilogue)
    x = conv3x3_bn(x, P['conv1_w'], 2, 1, *P['bn1'], relu=True)
    x = conv3x3_bn(x, P['conv2_w'], 1, 1, *P['bn2'], relu=True)
    x = block_forward(x, P['block1'])
    x = jnp.maximum(x, 0)                   # explicit relu in Xception65.forward
    x = block_forward(x, P['block2'])
    x = block_forward(x, P['block3'])
    for bp in P['mid']:
        x = block_forward(x, bp)
    x = block_forward(x, P['block20'])
    x = jnp.maximum(x, 0)
    x = sepconv_bn(x, P['conv3'], pre_relu=False, post_relu=True)  # +bn3+relu
    x = sepconv_bn(x, P['conv4'], pre_relu=False, post_relu=True)  # +bn4+relu
    x = sepconv_bn(x, P['conv5'], pre_relu=False, post_relu=True)  # +bn5+relu
    x = jnp.mean(x.astype(jnp.float32), axis=(1, 2))               # GlobalAvgPool
    logits = pallas_matmul(x, P['fc_w'],
                           jnp.ones((P['fc_w'].shape[1],), jnp.float32),
                           P['fc_b'], relu=False, out_dtype=jnp.float32)
    return logits[:, :1000]


if __name__ == "__main__":
    key = jax.random.PRNGKey(0)
    # NCHW input (PyTorch convention); 3 channels required by conv1.
    x = jax.random.normal(key, (2, 3, 32, 32), jnp.float32)
    params = build_params(output_stride=32, seed=0)
    out = xception65_forward(x, params)
    out = jax.block_until_ready(out)
    assert out.shape == (2, 1000)
    assert bool(jnp.all(jnp.isfinite(out)))
    print("KERNEL_OK")
</pallas_src>

<mosaic_0001>
module attributes {stable_mosaic.version = 11 : i64} {
  func.func @_matmul_kernel(%arg0: i32, %arg1: i32, %arg2: i32, %arg3: memref<512x128xbf16, #tpu.memory_space<vmem>>, %arg4: memref<128x128xbf16, #tpu.memory_space<vmem>>, %arg5: memref<1x128xf32, #tpu.memory_space<vmem>>, %arg6: memref<1x128xf32, #tpu.memory_space<vmem>>, %arg7: memref<512x128xbf16, #tpu.memory_space<vmem>>, %arg8: memref<512x128xf32, #tpu.memory_space<vmem>>) attributes {dimension_semantics = [#tpu.dimension_semantics<parallel>, #tpu.dimension_semantics<parallel>, #tpu.dimension_semantics<arbitrary>], iteration_bounds = array<i64: 1, 1, 1>, scalar_prefetch = 0 : i64, scratch_operands = 1 : i64, tpu.core_type = #tpu.core_type<tc>, window_params = [{transform_indices = @transform_0, window_bounds = array<i64: 512, 128>}, {transform_indices = @transform_1, window_bounds = array<i64: 128, 128>}, {transform_indices = @transform_2, window_bounds = array<i64: 1, 128>}, {transform_indices = @transform_3, window_bounds = array<i64: 1, 128>}, {transform_indices = @transform_4, window_bounds = array<i64: 512, 128>}]} {
    %c0_i32 = arith.constant 0 : i32
    %0 = arith.cmpi eq, %arg2, %c0_i32 : i32
    %1 = arith.extui %0 : i1 to i32
    %c0_i32_0 = arith.constant 0 : i32
    %2 = arith.cmpi ne, %1, %c0_i32_0 : i32
    scf.if %2 {
      %cst_10 = arith.constant 0.000000e+00 : f32
      %12 = vector.broadcast %cst_10 : f32 to vector<512x128xf32>
      %c0_11 = arith.constant 0 : index
      %c0_12 = arith.constant 0 : index
      %13 = vector.load %arg8[%c0_11, %c0_12] : memref<512x128xf32, #tpu.memory_space<vmem>>, vector<512x128xf32>
      tpu.vector_store %arg8[%c0_11, %c0_12], %12 {strides = array<i32>} : memref<512x128xf32, #tpu.memory_space<vmem>>, vector<512x128xf32>,
    } else {
    }
    %c0 = arith.constant 0 : index
    %c0_1 = arith.constant 0 : index
    %3 = vector.load %arg8[%c0, %c0_1] : memref<512x128xf32, #tpu.memory_space<vmem>>, vector<512x128xf32>
    %c0_2 = arith.constant 0 : index
    %c0_3 = arith.constant 0 : index
    %4 = vector.load %arg3[%c0_2, %c0_3] : memref<512x128xbf16, #tpu.memory_space<vmem>>, vector<512x128xbf16>
    %c0_4 = arith.constant 0 : index
    %c0_5 = arith.constant 0 : index
    %5 = vector.load %arg4[%c0_4, %c0_5] : memref<128x128xbf16, #tpu.memory_space<vmem>>, vector<128x128xbf16>
    %cst = arith.constant dense<0.000000e+00> : vector<512x128xf32>
    %6 = tpu.matmul %4, %5, %cst {dimension_numbers = #tpu.dot_dimension_numbers<[1], [0], [0], [1], [0, 0, 1, 1], [], []>} : vector<512x128xbf16>, vector<128x128xbf16>, vector<512x128xf32> -> vector<512x128xf32>
    %7 = arith.addf %3, %6 : vector<512x128xf32>
    %c0_6 = arith.constant 0 : index
    %c0_7 = arith.constant 0 : index
    %8 = vector.load %arg8[%c0_6, %c0_7] : memref<512x128xf32, #tpu.memory_space<vmem>>, vector<512x128xf32>
    tpu.vector_store %arg8[%c0_6, %c0_7], %7 {strides = array<i32>} : memref<512x128xf32, #tpu.memory_space<vmem>>, vector<512x128xf32>,
    %c0_i32_8 = arith.constant 0 : i32
    %9 = arith.cmpi eq, %arg2, %c0_i32_8 : i32
    %10 = arith.extui %9 : i1 to i32
    %c0_i32_9 = arith.constant 0 : i32
    %11 = arith.cmpi ne, %10, %c0_i32_9 : i32
    scf.if %11 {
      %c0_10 = arith.constant 0 : index
      %c0_11 = arith.constant 0 : index
      %12 = vector.load %arg8[%c0_10, %c0_11] : memref<512x128xf32, #tpu.memory_space<vmem>>, vector<512x128xf32>
      %c0_12 = arith.constant 0 : index
      %c0_13 = arith.constant 0 : index
      %13 = vector.load %arg5[%c0_12, %c0_13] : memref<1x128xf32, #tpu.memory_space<vmem>>, vector<1x128xf32>
      %14 = vector.broadcast %13 : vector<1x128xf32> to vector<512x128xf32>
      %15 = arith.mulf %12, %14 : vector<512x128xf32>
      %c0_14 = arith.constant 0 : index
      %c0_15 = arith.constant 0 : index
      %16 = vector.load %arg6[%c0_14, %c0_15] : memref<1x128xf32, #tpu.memory_space<vmem>>, vector<1x128xf32>
      %17 = vector.broadcast %16 : vector<1x128xf32> to vector<512x128xf32>
      %18 = arith.addf %15, %17 : vector<512x128xf32>
      %cst_16 = arith.constant 0.000000e+00 : f32
      %19 = vector.broadcast %cst_16 : f32 to vector<512x128xf32>
      %20 = arith.maximumf %18, %19 : vector<512x128xf32>
      %21 = arith.truncf %20 : vector<512x128xf32> to vector<512x128xbf16>
      %c0_17 = arith.constant 0 : index
      %c0_18 = arith.constant 0 : index
      %22 = vector.load %arg7[%c0_17, %c0_18] : memref<512x128xbf16, #tpu.memory_space<vmem>>, vector<512x128xbf16>
      tpu.vector_store %arg7[%c0_17, %c0_18], %21 {strides = array<i32>} : memref<512x128xbf16, #tpu.memory_space<vmem>>, vector<512x128xbf16>,
    } else {
    }
    return
  }
  func.func @transform_0(%arg0: i32, %arg1: i32, %arg2: i32) -> (i32, i32) {
    %c0_i32 = arith.constant 0 : i32
    return %arg0, %arg2 : i32, i32
  }
  func.func @transform_1(%arg0: i32, %arg1: i32, %arg2: i32) -> (i32, i32) {
    %c0_i32 = arith.constant 0 : i32
    return %arg2, %arg1 : i32, i32
  }
  func.func @transform_2(%arg0: i32, %arg1: i32, %arg2: i32) -> (i32, i32) {
    %c0_i32 = arith.constant 0 : i32
    %c0_i32_0 = arith.constant 0 : i32
    return %c0_i32, %arg1 : i32, i32
  }
  func.func @transform_3(%arg0: i32, %arg1: i32, %arg2: i32) -> (i32, i32) {
    %c0_i32 = arith.constant 0 : i32
    %c0_i32_0 = arith.constant 0 : i32
    return %c0_i32, %arg1 : i32, i32
  }
  func.func @transform_4(%arg0: i32, %arg1: i32, %arg2: i32) -> (i32, i32) {
    %c0_i32 = arith.constant 0 : i32
    return %arg0, %arg1 : i32, i32
  }
}

</mosaic_0001>

<bundles_post_ra>
// kernel: pallas_matmul.1
= control target key start
LH: loop header
LB: loop body
LE: loop exit
PB: predicated region body
PF: predicated region fallthrough
CT: control target
= control target key end

     0   :  { %s2348_s0 = inlined_call_operand.vmem [shape: bf16[512,128], index: 0, kind: input, shape index: {}]   ;;  %s2349_s1 = inlined_call_operand.vmem [shape: bf16[128,128], index: 1, kind: input, shape index: {}]   ;;  %s2350_s2 = inlined_call_operand.vmem [shape: f32[1,128], index: 2, kind: input, shape index: {}]   ;;  %s2351_s3 = inlined_call_operand.vmem [shape: f32[1,128], index: 3, kind: input, shape index: {}]   ;;  %s2352_s4 = inlined_call_operand.hbm [shape: bf16[512,128], index: 4, kind: output, shape index: {}]  }
   0x1   :  { %v1997_v0 = vld [vmem:[%s2349_s1 + $0x38] sm:$0xff]   ;;  %v1998_v1 = vld [vmem:[%s2349_s1 + $0x30] sm:$0xff]   ;;  %v1999_v2 = vld [vmem:[%s2349_s1 + $0x28] sm:$0xff]  }
   0x2   :  { %1898 = vmatprep.subr.bf16.mxu0 %v1997_v0  ;;  %1978 = vmatprep.subr.bf16.mxu1 %v1997_v0  ;;  %v2000_v3 = vld [vmem:[%s2349_s1 + $0x20] sm:$0xff]   ;;  %v2001_v6 = vld [vmem:[%s2349_s1 + $0x18] sm:$0xff]   ;;  %v2002_v7 = vld [vmem:[%s2349_s1 + $0x10] sm:$0xff]  }
   0x3   :  { %1899 = vmatpush3.bf16.msra.mxu0 %v1997_v0  ;;  %1986 = vmatpush3.bf16.msra.mxu1 %v1997_v0  ;;  %v2005_v4 = vld [vmem:[%s2348_s0] sm:$0xff]   ;;  %v2003_v8 = vld [vmem:[%s2349_s1 + $0x8] sm:$0xff]   ;;  %v2009_v12 = vld [vmem:[%s2348_s0 + $0x10] sm:$0xff]  }
   0x4   :  { %1900 = vmatprep.subr.bf16.mxu0 %v1998_v1  ;;  %1979 = vmatprep.subr.bf16.mxu1 %v1998_v1  ;;  %v2006_v5 = vld [vmem:[%s2348_s0 + $0x80] sm:$0xff]   ;;  %v2007_v10 = vld [vmem:[%s2348_s0 + $0x8] sm:$0xff]   ;;  %v2010_v13 = vld [vmem:[%s2348_s0 + $0x90] sm:$0xff]  }
   0x5   :  { %1914 = vmatprep.mubr.bf16.mxu0 %v2005_v4  ;;  %1946 = vmatprep.mubr.bf16.mxu1 %v2006_v5  ;;  %v2004_v9 = vld [vmem:[%s2349_s1] sm:$0xff]   ;;  %v2008_v11 = vld [vmem:[%s2348_s0 + $0x88] sm:$0xff]   ;;  %v2011_v14 = vld [vmem:[%s2348_s0 + $0x18] sm:$0xff]  }
   0x6   :  { %v2012_v15 = vld [vmem:[%s2348_s0 + $0x98] sm:$0xff]   ;;  %v2013_v16 = vld [vmem:[%s2348_s0 + $0x20] sm:$0xff]  }
   0x7   :  { %1901 = vmatpush3.bf16.msra.mxu0 %v1998_v1  ;;  %1987 = vmatpush3.bf16.msra.mxu1 %v1998_v1  ;;  %v2014_v17 = vld [vmem:[%s2348_s0 + $0xa0] sm:$0xff]  }
   0x8   :  { %1902 = vmatprep.subr.bf16.mxu0 %v1999_v2  ;;  %1980 = vmatprep.subr.bf16.mxu1 %v1999_v2 }
   0xb   :  { %1903 = vmatpush3.bf16.msra.mxu0 %v1999_v2  ;;  %1988 = vmatpush3.bf16.msra.mxu1 %v1999_v2 }
   0xc   :  { %1904 = vmatprep.subr.bf16.mxu0 %v2000_v3  ;;  %1981 = vmatprep.subr.bf16.mxu1 %v2000_v3 }
   0xf   :  { %1905 = vmatpush3.bf16.msra.mxu0 %v2000_v3  ;;  %1989 = vmatpush3.bf16.msra.mxu1 %v2000_v3 }
  0x10   :  { %1906 = vmatprep.subr.bf16.mxu0 %v2001_v6  ;;  %1982 = vmatprep.subr.bf16.mxu1 %v2001_v6 }
  0x13   :  { %1907 = vmatpush3.bf16.msra.mxu0 %v2001_v6  ;;  %1990 = vmatpush3.bf16.msra.mxu1 %v2001_v6 }
  0x14   :  { %1908 = vmatprep.subr.bf16.mxu0 %v2002_v7  ;;  %1983 = vmatprep.subr.bf16.mxu1 %v2002_v7 }
  0x17   :  { %1909 = vmatpush3.bf16.msra.mxu0 %v2002_v7  ;;  %1991 = vmatpush3.bf16.msra.mxu1 %v2002_v7 }
  0x18   :  { %1910 = vmatprep.subr.bf16.mxu0 %v2003_v8  ;;  %1984 = vmatprep.subr.bf16.mxu1 %v2003_v8 }
  0x1b   :  { %1911 = vmatpush3.bf16.msra.mxu0 %v2003_v8  ;;  %1992 = vmatpush3.bf16.msra.mxu1 %v2003_v8 }
  0x1c   :  { %1912 = vmatprep.subr.bf16.mxu0 %v2004_v9  ;;  %1985 = vmatprep.subr.bf16.mxu1 %v2004_v9 }
  0x1f   :  { %1913 = vmatpush3.bf16.msra.mxu0 %v2004_v9  ;;  %1993 = vmatpush3.bf16.msra.mxu1 %v2004_v9 }
  0x22   :  { %1915 = vmatmul.mubr.bf16.vlgmr.msra.gmra.mxu0 %v2007_v10  ;;  %1947 = vmatmul.mubr.bf16.vlgmr.msra.gmra.mxu1 %v2008_v11 }
  0x23   :  { %1918 = vmatprep.mubr.bf16.mxu0 %v2009_v12  ;;  %1950 = vmatprep.mubr.bf16.mxu1 %v2010_v13 }
  0x24   :  { %9 = vsyncpa [#allocation4], 0  ;;  %v2015_v18 = vld [vmem:[%s2348_s0 + $0x28] sm:$0xff]   ;;  %v2017_v20 = vld [vmem:[%s2348_s0 + $0x30] sm:$0xff]  }
  0x25   :  { %v2016_v19 = vld [vmem:[%s2348_s0 + $0xa8] sm:$0xff]   ;;  %v2018_v21 = vld [vmem:[%s2348_s0 + $0xb0] sm:$0xff]   ;;  %v2019_v22 = vld [vmem:[%s2348_s0 + $0x38] sm:$0xff]  }
  0x26   :  { %v2020_v23 = vld [vmem:[%s2348_s0 + $0xb8] sm:$0xff]   ;;  %v2021_v24 = vld [vmem:[%s2348_s0 + $0x40] sm:$0xff]   ;;  %v2023_v26 = vld [vmem:[%s2348_s0 + $0x48] sm:$0xff]  }
  0x27   :  { %v2022_v25 = vld [vmem:[%s2348_s0 + $0xc0] sm:$0xff]   ;;  %v2024_v27 = vld [vmem:[%s2348_s0 + $0xc8] sm:$0xff]   ;;  %v2025_v28 = vld [vmem:[%s2348_s0 + $0x50] sm:$0xff]  }
  0x28   :  { %v2026_v29 = vld [vmem:[%s2348_s0 + $0xd0] sm:$0xff]   ;;  %v2027_v30 = vld [vmem:[%s2348_s0 + $0x58] sm:$0xff]   ;;  %v2029_v32 = vld [vmem:[%s2348_s0 + $0x60] sm:$0xff]  }
  0x29   :  { %v2028_v31 = vld [vmem:[%s2348_s0 + $0xd8] sm:$0xff]   ;;  %v2030_v33 = vld [vmem:[%s2348_s0 + $0xe0] sm:$0xff]   ;;  %v2031_v34 = vld [vmem:[%s2348_s0 + $0x68] sm:$0xff]  }
  0x2a   :  { %1919 = vmatmul.mubr.bf16.gmra.mxu0 %v2011_v14  ;;  %1951 = vmatmul.mubr.bf16.gmra.mxu1 %v2012_v15  ;;  %v2032_v35 = vld [vmem:[%s2348_s0 + $0xe8] sm:$0xff]   ;;  %v2033_v36 = vld [vmem:[%s2348_s0 + $0x70] sm:$0xff]   ;;  %v2035_v38 = vld [vmem:[%s2348_s0 + $0x78] sm:$0xff]  }
  0x2b   :  { %1922 = vmatprep.mubr.bf16.mxu0 %v2013_v16  ;;  %1954 = vmatprep.mubr.bf16.mxu1 %v2014_v17  ;;  %v2034_v37 = vld [vmem:[%s2348_s0 + $0xf0] sm:$0xff]   ;;  %v2036_v39 = vld [vmem:[%s2348_s0 + $0xf8] sm:$0xff]   ;;  %v2210_v40 = vld [vmem:[%s2350_s2] ss:$0 sm:$0xff]  ;;  %s2059_s0 = smov [#allocation3]  }
  0x2c   :  { %v2217_v45 = vld [vmem:[%s2351_s3] ss:$0 sm:$0xff]  ;;  %s1486_s2 = sshll.u32 %s2059_s0, 4  ;;  %s1487_s2 = int_to_ptr.vmem [resolvable:$true] %s1486_s2 }
  0x2d   :  { %s2037_s3 = scalar_lea.vmem %s1487_s2, 4096  ;;  %p2042_p1 = scmp.lt.s32.totalorder %s1487_s2, %s1487_s2 }
  0x2e   :  { %p2038_p0 = scmp.ne.s32.totalorder %s1487_s2, %s2037_s3  ;;  %p2043_p2 = scmp.lt.s32.totalorder %s2037_s3, %s2037_s3 }
  0x30   :  { %p2044_p3 = por %p2043_p2, %p2042_p1 }
  0x32   :  { %1923 = vmatmul.mubr.bf16.gmra.mxu0 %v2015_v18  ;;  %1955 = vmatmul.mubr.bf16.gmra.mxu1 %v2016_v19  ;;  %p2045_p4 = pnand %p2044_p3, %p2038_p0 }
  0x33   :  { %1926 = vmatprep.mubr.bf16.mxu0 %v2017_v20  ;;  %1958 = vmatprep.mubr.bf16.mxu1 %v2018_v21 }
  0x3a   :  { %1927 = vmatmul.mubr.bf16.gmra.mxu0 %v2019_v22  ;;  %1959 = vmatmul.mubr.bf16.gmra.mxu1 %v2020_v23 }
  0x3b   :  { %1930 = vmatprep.mubr.bf16.mxu0 %v2021_v24  ;;  %1962 = vmatprep.mubr.bf16.mxu1 %v2022_v25 }
  0x42   :  { %1931 = vmatmul.mubr.bf16.gmra.mxu0 %v2023_v26  ;;  %1963 = vmatmul.mubr.bf16.gmra.mxu1 %v2024_v27 }
  0x43   :  { %1934 = vmatprep.mubr.bf16.mxu0 %v2025_v28  ;;  %1966 = vmatprep.mubr.bf16.mxu1 %v2026_v29 }
  0x4a   :  { %1935 = vmatmul.mubr.bf16.gmra.mxu0 %v2027_v30  ;;  %1967 = vmatmul.mubr.bf16.gmra.mxu1 %v2028_v31 }
  0x4b   :  { %1938 = vmatprep.mubr.bf16.mxu0 %v2029_v32  ;;  %1970 = vmatprep.mubr.bf16.mxu1 %v2030_v33 }
  0x52   :  { %1939 = vmatmul.mubr.bf16.gmra.mxu0 %v2031_v34  ;;  %1971 = vmatmul.mubr.bf16.gmra.mxu1 %v2032_v35 }
  0x53   :  { %1942 = vmatprep.mubr.bf16.mxu0 %v2033_v36  ;;  %1974 = vmatprep.mubr.bf16.mxu1 %v2034_v37 }
  0x5a   :  { %1943 = vmatmul.mubr.bf16.gmra.mxu0 %v2035_v38  ;;  %1975 = vmatmul.mubr.bf16.gmra.mxu1 %v2036_v39 }
  0xe2   :  { %v1916_v41 = vpop.f32.mrf.mxu0  ;;  %v1948_v42 = vpop.f32.mrf.mxu1 }
  0xe3   :  { %v964_v43 = vmul.f32 %v1916_v41, %v2210_v40  ;;  %v996_v44 = vmul.f32 %v1948_v42, %v2210_v40 }
  0xe4   :  { %v505_v46 = vpop.f32.mrf.mxu0  ;;  %v633_v47 = vpop.f32.mrf.mxu1 }
  0xe5   :  { %v962_v48 = vmul.f32 %v2210_v40, %v505_v46  ;;  %v994_v49 = vmul.f32 %v2210_v40, %v633_v47  ;;  %v1035_v52 = vadd.f32 %v2217_v45, %v964_v43  ;;  %v1067_v53 = vadd.f32 %v2217_v45, %v996_v44 }
  0xe6   :  { %v1917_v50 = vpop.f32.mrf.mxu0  ;;  %v1949_v51 = vpop.f32.mrf.mxu1 }
  0xe7   :  { %v965_v54 = vmul.f32 %v1917_v50, %v2210_v40  ;;  %v997_v55 = vmul.f32 %v1949_v51, %v2210_v40  ;;  %v1033_v58 = vadd.f32 %v2217_v45, %v962_v48  ;;  %v1065_v59 = vadd.f32 %v2217_v45, %v994_v49 }
  0xe8   :  { %v508_v56 = vpop.f32.mrf.mxu0  ;;  %v636_v57 = vpop.f32.mrf.mxu1  ;;  %v1099_v2 = vmax.f32 %v1035_v52, 0.0  ;;  %v1131_v3 = vmax.f32 %v1067_v53, 0.0 }
  0xe9   :  { %v963_v60 = vmul.f32 %v2210_v40, %v508_v56  ;;  %v995_v61 = vmul.f32 %v2210_v40, %v636_v57  ;;  %v1036_v62 = vadd.f32 %v2217_v45, %v965_v54  ;;  %v1068_v63 = vadd.f32 %v2217_v45, %v997_v55 }
  0xea   :  { %v1920_v0 = vpop.f32.mrf.mxu0  ;;  %v1952_v1 = vpop.f32.mrf.mxu1  ;;  %v1097_v12 = vmax.f32 %v1033_v58, 0.0  ;;  %v1129_v13 = vmax.f32 %v1065_v59, 0.0 }
  0xeb   :  { %v1034_v4 = vadd.f32 %v2217_v45, %v963_v60  ;;  %v1066_v5 = vadd.f32 %v2217_v45, %v995_v61  ;;  %v1100_v6 = vmax.f32 %v1036_v62, 0.0  ;;  %v1132_v7 = vmax.f32 %v1068_v63, 0.0 }
  0xec   :  { %v968_v8 = vmul.f32 %v1920_v0, %v2210_v40  ;;  %v1000_v9 = vmul.f32 %v1952_v1, %v2210_v40  ;;  %v521_v10 = vpop.f32.mrf.mxu0  ;;  %v649_v11 = vpop.f32.mrf.mxu1 }
  0xed   :  { %v1098_v14 = vmax.f32 %v1034_v4, 0.0  ;;  %v1130_v15 = vmax.f32 %v1066_v5, 0.0  ;;  %v1675_v16 = vpack.c.bf16 %v1100_v6, %v1099_v2  ;;  %v1755_v17 = vpack.c.bf16 %v1132_v7, %v1131_v3 }
  0xee   :  { %v966_v18 = vmul.f32 %v2210_v40, %v521_v10  ;;  %v998_v19 = vmul.f32 %v2210_v40, %v649_v11  ;;  %v1921_v20 = vpop.f32.mrf.mxu0  ;;  %v1953_v21 = vpop.f32.mrf.mxu1  ;;  %v1039_v24 = vadd.f32 %v2217_v45, %v968_v8  ;;  %v1071_v25 = vadd.f32 %v2217_v45, %v1000_v9 }
  0xef   :  { %v1670_v22 = vpack.c.bf16 %v1098_v14, %v1097_v12  ;;  %v1750_v23 = vpack.c.bf16 %v1130_v15, %v1129_v13  ;;  %1827 = vst [vmem:[#allocation3 + $0x8] sm:$0xff] %v1675_v16   ;;  %1843 = vst [vmem:[#allocation3 + $0x88] sm:$0xff] %v1755_v17   ;;  %v969_v26 = vmul.f32 %v1921_v20, %v2210_v40 }
  0xf0   :  { %v1001_v27 = vmul.f32 %v1953_v21, %v2210_v40  ;;  %v524_v28 = vpop.f32.mrf.mxu0  ;;  %v652_v29 = vpop.f32.mrf.mxu1  ;;  %v1037_v30 = vadd.f32 %v2217_v45, %v966_v18  ;;  %v1069_v31 = vadd.f32 %v2217_v45, %v998_v19  ;;  %v1103_v43 = vmax.f32 %v1039_v24, 0.0 }
  0xf1   :  { %1671 = vst [vmem:[#allocation3] sm:$0xff] %v1670_v22   ;;  %1842 = vst [vmem:[#allocation3 + $0x80] sm:$0xff] %v1750_v23   ;;  %v967_v32 = vmul.f32 %v2210_v40, %v524_v28  ;;  %v999_v33 = vmul.f32 %v2210_v40, %v652_v29  ;;  %v1040_v34 = vadd.f32 %v2217_v45, %v969_v26  ;;  %v1135_v44 = vmax.f32 %v1071_v25, 0.0 }
  0xf2   :  { %v1072_v35 = vadd.f32 %v2217_v45, %v1001_v27  ;;  %v1924_v36 = vpop.f32.mrf.mxu0  ;;  %v1956_v37 = vpop.f32.mrf.mxu1  ;;  %v1101_v50 = vmax.f32 %v1037_v30, 0.0  ;;  %v1133_v51 = vmax.f32 %v1069_v31, 0.0 }
  0xf3   :  { %v1038_v38 = vadd.f32 %v2217_v45, %v967_v32  ;;  %v1070_v39 = vadd.f32 %v2217_v45, %v999_v33  ;;  %v972_v41 = vmul.f32 %v1924_v36, %v2210_v40  ;;  %v1004_v42 = vmul.f32 %v1956_v37, %v2210_v40 }
  0xf4   :  { %v1104_v46 = vmax.f32 %v1040_v34, 0.0  ;;  %v1136_v47 = vmax.f32 %v1072_v35, 0.0  ;;  %v537_v48 = vpop.f32.mrf.mxu0  ;;  %v665_v49 = vpop.f32.mrf.mxu1 }
  0xf5   :  { %v1102_v52 = vmax.f32 %v1038_v38, 0.0  ;;  %v1134_v53 = vmax.f32 %v1070_v39, 0.0  ;;  %v970_v56 = vmul.f32 %v2210_v40, %v537_v48  ;;  %v1002_v57 = vmul.f32 %v2210_v40, %v665_v49 }
  0xf6   :  { %v1685_v54 = vpack.c.bf16 %v1104_v46, %v1103_v43  ;;  %v1765_v55 = vpack.c.bf16 %v1136_v47, %v1135_v44  ;;  %v1925_v58 = vpop.f32.mrf.mxu0  ;;  %v1957_v59 = vpop.f32.mrf.mxu1  ;;  %v1043_v62 = vadd.f32 %v2217_v45, %v972_v41  ;;  %v1075_v63 = vadd.f32 %v2217_v45, %v1004_v42 }
  0xf7   :  { %v1680_v60 = vpack.c.bf16 %v1102_v52, %v1101_v50  ;;  %v1760_v61 = vpack.c.bf16 %v1134_v53, %v1133_v51  ;;  %v973_v0 = vmul.f32 %v1925_v58, %v2210_v40  ;;  %v1005_v1 = vmul.f32 %v1957_v59, %v2210_v40 }
  0xf8   :  { %1829 = vst [vmem:[#allocation3 + $0x18] sm:$0xff] %v1685_v54   ;;  %1845 = vst [vmem:[#allocation3 + $0x98] sm:$0xff] %v1765_v55   ;;  %v540_v2 = vpop.f32.mrf.mxu0  ;;  %v668_v3 = vpop.f32.mrf.mxu1  ;;  %v1041_v4 = vadd.f32 %v2217_v45, %v970_v56  ;;  %v1073_v5 = vadd.f32 %v2217_v45, %v1002_v57  ;;  %v1107_v12 = vmax.f32 %v1043_v62, 0.0  ;;  %v1139_v13 = vmax.f32 %v1075_v63, 0.0 }
  0xf9   :  { %1828 = vst [vmem:[#allocation3 + $0x10] sm:$0xff] %v1680_v60   ;;  %1844 = vst [vmem:[#allocation3 + $0x90] sm:$0xff] %v1760_v61   ;;  %v971_v6 = vmul.f32 %v2210_v40, %v540_v2  ;;  %v1003_v7 = vmul.f32 %v2210_v40, %v668_v3  ;;  %v1044_v8 = vadd.f32 %v2217_v45, %v973_v0 }
  0xfa   :  { %v1076_v9 = vadd.f32 %v2217_v45, %v1005_v1  ;;  %v1928_v10 = vpop.f32.mrf.mxu0  ;;  %v1960_v11 = vpop.f32.mrf.mxu1  ;;  %v1105_v22 = vmax.f32 %v1041_v4, 0.0  ;;  %v1137_v23 = vmax.f32 %v1073_v5, 0.0 }
  0xfb   :  { %v1042_v14 = vadd.f32 %v2217_v45, %v971_v6  ;;  %v1074_v15 = vadd.f32 %v2217_v45, %v1003_v7  ;;  %v1108_v16 = vmax.f32 %v1044_v8, 0.0  ;;  %v976_v18 = vmul.f32 %v1928_v10, %v2210_v40 }
  0xfc   :  { %v1140_v17 = vmax.f32 %v1076_v9, 0.0  ;;  %v1008_v19 = vmul.f32 %v1960_v11, %v2210_v40  ;;  %v553_v20 = vpop.f32.mrf.mxu0  ;;  %v681_v21 = vpop.f32.mrf.mxu1 }
  0xfd   :  { %v1106_v24 = vmax.f32 %v1042_v14, 0.0  ;;  %v1138_v25 = vmax.f32 %v1074_v15, 0.0  ;;  %v1695_v26 = vpack.c.bf16 %v1108_v16, %v1107_v12  ;;  %v974_v28 = vmul.f32 %v2210_v40, %v553_v20 }
  0xfe   :  { %v1775_v27 = vpack.c.bf16 %v1140_v17, %v1139_v13  ;;  %v1006_v29 = vmul.f32 %v2210_v40, %v681_v21  ;;  %v1929_v30 = vpop.f32.mrf.mxu0  ;;  %v1961_v31 = vpop.f32.mrf.mxu1  ;;  %v1047_v34 = vadd.f32 %v2217_v45, %v976_v18  ;;  %v1079_v35 = vadd.f32 %v2217_v45, %v1008_v19 }
  0xff   :  { %v1690_v32 = vpack.c.bf16 %v1106_v24, %v1105_v22  ;;  %v1770_v33 = vpack.c.bf16 %v1138_v25, %v1137_v23  ;;  %1831 = vst [vmem:[#allocation3 + $0x28] sm:$0xff] %v1695_v26   ;;  %v977_v36 = vmul.f32 %v1929_v30, %v2210_v40  ;;  %v1009_v37 = vmul.f32 %v1961_v31, %v2210_v40 }
 0x100   :  { %1847 = vst [vmem:[#allocation3 + $0xa8] sm:$0xff] %v1775_v27   ;;  %v556_v38 = vpop.f32.mrf.mxu0  ;;  %v684_v39 = vpop.f32.mrf.mxu1  ;;  %v1045_v41 = vadd.f32 %v2217_v45, %v974_v28  ;;  %v1077_v42 = vadd.f32 %v2217_v45, %v1006_v29  ;;  %v1111_v54 = vmax.f32 %v1047_v34, 0.0  ;;  %v1143_v55 = vmax.f32 %v1079_v35, 0.0 }
 0x101   :  { %1830 = vst [vmem:[#allocation3 + $0x20] sm:$0xff] %v1690_v32   ;;  %1846 = vst [vmem:[#allocation3 + $0xa0] sm:$0xff] %v1770_v33   ;;  %v975_v43 = vmul.f32 %v2210_v40, %v556_v38  ;;  %v1007_v44 = vmul.f32 %v2210_v40, %v684_v39  ;;  %v1048_v46 = vadd.f32 %v2217_v45, %v977_v36 }
 0x102   :  { %v1080_v47 = vadd.f32 %v2217_v45, %v1009_v37  ;;  %v1932_v48 = vpop.f32.mrf.mxu0  ;;  %v1964_v49 = vpop.f32.mrf.mxu1  ;;  %v1109_v60 = vmax.f32 %v1045_v41, 0.0  ;;  %v1141_v61 = vmax.f32 %v1077_v42, 0.0 }
 0x103   :  { %v1046_v50 = vadd.f32 %v2217_v45, %v975_v43  ;;  %v1078_v51 = vadd.f32 %v2217_v45, %v1007_v44  ;;  %v980_v52 = vmul.f32 %v1932_v48, %v2210_v40  ;;  %v1012_v53 = vmul.f32 %v1964_v49, %v2210_v40 }
 0x104   :  { %v1112_v56 = vmax.f32 %v1048_v46, 0.0  ;;  %v1144_v57 = vmax.f32 %v1080_v47, 0.0  ;;  %v569_v58 = vpop.f32.mrf.mxu0  ;;  %v697_v59 = vpop.f32.mrf.mxu1 }
 0x105   :  { %v1110_v62 = vmax.f32 %v1046_v50, 0.0  ;;  %v1142_v63 = vmax.f32 %v1078_v51, 0.0  ;;  %v978_v2 = vmul.f32 %v2210_v40, %v569_v58  ;;  %v1010_v3 = vmul.f32 %v2210_v40, %v697_v59 }
 0x106   :  { %v1705_v0 = vpack.c.bf16 %v1112_v56, %v1111_v54  ;;  %v1785_v1 = vpack.c.bf16 %v1144_v57, %v1143_v55  ;;  %v1933_v4 = vpop.f32.mrf.mxu0  ;;  %v1965_v5 = vpop.f32.mrf.mxu1  ;;  %v1051_v8 = vadd.f32 %v2217_v45, %v980_v52  ;;  %v1083_v9 = vadd.f32 %v2217_v45, %v1012_v53 }
 0x107   :  { %v1700_v6 = vpack.c.bf16 %v1110_v62, %v1109_v60  ;;  %v1780_v7 = vpack.c.bf16 %v1142_v63, %v1141_v61  ;;  %v981_v10 = vmul.f32 %v1933_v4, %v2210_v40  ;;  %v1013_v11 = vmul.f32 %v1965_v5, %v2210_v40 }
 0x108   :  { %1833 = vst [vmem:[#allocation3 + $0x38] sm:$0xff] %v1705_v0   ;;  %1849 = vst [vmem:[#allocation3 + $0xb8] sm:$0xff] %v1785_v1   ;;  %v572_v12 = vpop.f32.mrf.mxu0  ;;  %v700_v13 = vpop.f32.mrf.mxu1  ;;  %v1049_v14 = vadd.f32 %v2217_v45, %v978_v2  ;;  %v1081_v15 = vadd.f32 %v2217_v45, %v1010_v3  ;;  %v1115_v22 = vmax.f32 %v1051_v8, 0.0  ;;  %v1147_v23 = vmax.f32 %v1083_v9, 0.0 }
 0x109   :  { %1832 = vst [vmem:[#allocation3 + $0x30] sm:$0xff] %v1700_v6   ;;  %1848 = vst [vmem:[#allocation3 + $0xb0] sm:$0xff] %v1780_v7   ;;  %v979_v16 = vmul.f32 %v2210_v40, %v572_v12  ;;  %v1011_v17 = vmul.f32 %v2210_v40, %v700_v13  ;;  %v1052_v18 = vadd.f32 %v2217_v45, %v981_v10 }
 0x10a   :  { %v1084_v19 = vadd.f32 %v2217_v45, %v1013_v11  ;;  %v1936_v20 = vpop.f32.mrf.mxu0  ;;  %v1968_v21 = vpop.f32.mrf.mxu1  ;;  %v1113_v32 = vmax.f32 %v1049_v14, 0.0  ;;  %v1145_v33 = vmax.f32 %v1081_v15, 0.0 }
 0x10b   :  { %v1050_v24 = vadd.f32 %v2217_v45, %v979_v16  ;;  %v1082_v25 = vadd.f32 %v2217_v45, %v1011_v17  ;;  %v1116_v26 = vmax.f32 %v1052_v18, 0.0  ;;  %v984_v28 = vmul.f32 %v1936_v20, %v2210_v40 }
 0x10c   :  { %v1148_v27 = vmax.f32 %v1084_v19, 0.0  ;;  %v1016_v29 = vmul.f32 %v1968_v21, %v2210_v40  ;;  %v585_v30 = vpop.f32.mrf.mxu0  ;;  %v713_v31 = vpop.f32.mrf.mxu1 }
 0x10d   :  { %v1114_v34 = vmax.f32 %v1050_v24, 0.0  ;;  %v1146_v35 = vmax.f32 %v1082_v25, 0.0  ;;  %v1715_v36 = vpack.c.bf16 %v1116_v26, %v1115_v22  ;;  %v982_v38 = vmul.f32 %v2210_v40, %v585_v30 }
 0x10e   :  { %v1795_v37 = vpack.c.bf16 %v1148_v27, %v1147_v23  ;;  %v1014_v39 = vmul.f32 %v2210_v40, %v713_v31  ;;  %v1937_v41 = vpop.f32.mrf.mxu0  ;;  %v1969_v42 = vpop.f32.mrf.mxu1  ;;  %v1055_v46 = vadd.f32 %v2217_v45, %v984_v28  ;;  %v1087_v47 = vadd.f32 %v2217_v45, %v1016_v29 }
 0x10f   :  { %v1710_v43 = vpack.c.bf16 %v1114_v34, %v1113_v32  ;;  %v1790_v44 = vpack.c.bf16 %v1146_v35, %v1145_v33  ;;  %1835 = vst [vmem:[#allocation3 + $0x48] sm:$0xff] %v1715_v36   ;;  %v985_v48 = vmul.f32 %v1937_v41, %v2210_v40  ;;  %v1017_v49 = vmul.f32 %v1969_v42, %v2210_v40 }
 0x110   :  { %1851 = vst [vmem:[#allocation3 + $0xc8] sm:$0xff] %v1795_v37   ;;  %v588_v50 = vpop.f32.mrf.mxu0  ;;  %v716_v51 = vpop.f32.mrf.mxu1  ;;  %v1053_v52 = vadd.f32 %v2217_v45, %v982_v38  ;;  %v1085_v53 = vadd.f32 %v2217_v45, %v1014_v39  ;;  %v1119_v0 = vmax.f32 %v1055_v46, 0.0  ;;  %v1151_v1 = vmax.f32 %v1087_v47, 0.0 }
 0x111   :  { %1834 = vst [vmem:[#allocation3 + $0x40] sm:$0xff] %v1710_v43   ;;  %1850 = vst [vmem:[#allocation3 + $0xc0] sm:$0xff] %v1790_v44   ;;  %v983_v54 = vmul.f32 %v2210_v40, %v588_v50  ;;  %v1015_v55 = vmul.f32 %v2210_v40, %v716_v51  ;;  %v1056_v56 = vadd.f32 %v2217_v45, %v985_v48 }
 0x112   :  { %v1088_v57 = vadd.f32 %v2217_v45, %v1017_v49  ;;  %v1940_v58 = vpop.f32.mrf.mxu0  ;;  %v1972_v59 = vpop.f32.mrf.mxu1  ;;  %v1117_v6 = vmax.f32 %v1053_v52, 0.0  ;;  %v1149_v7 = vmax.f32 %v1085_v53, 0.0 }
 0x113   :  { %v1054_v60 = vadd.f32 %v2217_v45, %v983_v54  ;;  %v1086_v61 = vadd.f32 %v2217_v45, %v1015_v55  ;;  %v988_v62 = vmul.f32 %v1940_v58, %v2210_v40  ;;  %v1020_v63 = vmul.f32 %v1972_v59, %v2210_v40 }
 0x114   :  { %v1120_v2 = vmax.f32 %v1056_v56, 0.0  ;;  %v1152_v3 = vmax.f32 %v1088_v57, 0.0  ;;  %v601_v4 = vpop.f32.mrf.mxu0  ;;  %v729_v5 = vpop.f32.mrf.mxu1 }
 0x115   :  { %v1118_v8 = vmax.f32 %v1054_v60, 0.0  ;;  %v1150_v9 = vmax.f32 %v1086_v61, 0.0  ;;  %v986_v12 = vmul.f32 %v2210_v40, %v601_v4  ;;  %v1018_v13 = vmul.f32 %v2210_v40, %v729_v5 }
 0x116   :  { %v1725_v10 = vpack.c.bf16 %v1120_v2, %v1119_v0  ;;  %v1805_v11 = vpack.c.bf16 %v1152_v3, %v1151_v1  ;;  %v1941_v14 = vpop.f32.mrf.mxu0  ;;  %v1973_v15 = vpop.f32.mrf.mxu1  ;;  %v1059_v18 = vadd.f32 %v2217_v45, %v988_v62  ;;  %v1091_v19 = vadd.f32 %v2217_v45, %v1020_v63 }
 0x117   :  { %v1720_v16 = vpack.c.bf16 %v1118_v8, %v1117_v6  ;;  %v1800_v17 = vpack.c.bf16 %v1150_v9, %v1149_v7  ;;  %v989_v20 = vmul.f32 %v1941_v14, %v2210_v40  ;;  %v1021_v21 = vmul.f32 %v1973_v15, %v2210_v40 }
 0x118   :  { %1837 = vst [vmem:[#allocation3 + $0x58] sm:$0xff] %v1725_v10   ;;  %1853 = vst [vmem:[#allocation3 + $0xd8] sm:$0xff] %v1805_v11   ;;  %v604_v22 = vpop.f32.mrf.mxu0  ;;  %v732_v23 = vpop.f32.mrf.mxu1  ;;  %v1057_v24 = vadd.f32 %v2217_v45, %v986_v12  ;;  %v1089_v25 = vadd.f32 %v2217_v45, %v1018_v13  ;;  %v1123_v32 = vmax.f32 %v1059_v18, 0.0  ;;  %v1155_v33 = vmax.f32 %v1091_v19, 0.0 }
 0x119   :  { %1836 = vst [vmem:[#allocation3 + $0x50] sm:$0xff] %v1720_v16   ;;  %1852 = vst [vmem:[#allocation3 + $0xd0] sm:$0xff] %v1800_v17   ;;  %v987_v26 = vmul.f32 %v2210_v40, %v604_v22  ;;  %v1019_v27 = vmul.f32 %v2210_v40, %v732_v23  ;;  %v1060_v28 = vadd.f32 %v2217_v45, %v989_v20 }
 0x11a   :  { %v1092_v29 = vadd.f32 %v2217_v45, %v1021_v21  ;;  %v1944_v30 = vpop.f32.mrf.mxu0  ;;  %v1976_v31 = vpop.f32.mrf.mxu1  ;;  %v1121_v43 = vmax.f32 %v1057_v24, 0.0  ;;  %v1153_v44 = vmax.f32 %v1089_v25, 0.0 }
 0x11b   :  { %v1058_v34 = vadd.f32 %v2217_v45, %v987_v26  ;;  %v1090_v35 = vadd.f32 %v2217_v45, %v1019_v27  ;;  %v1124_v36 = vmax.f32 %v1060_v28, 0.0  ;;  %v992_v38 = vmul.f32 %v1944_v30, %v2210_v40 }
 0x11c   :  { %v1156_v37 = vmax.f32 %v1092_v29, 0.0  ;;  %v1024_v39 = vmul.f32 %v1976_v31, %v2210_v40  ;;  %v617_v41 = vpop.f32.mrf.mxu0  ;;  %v745_v42 = vpop.f32.mrf.mxu1 }
 0x11d   :  { %v1122_v46 = vmax.f32 %v1058_v34, 0.0  ;;  %v1154_v47 = vmax.f32 %v1090_v35, 0.0  ;;  %v1735_v48 = vpack.c.bf16 %v1124_v36, %v1123_v32  ;;  %v990_v50 = vmul.f32 %v2210_v40, %v617_v41 }
 0x11e   :  { %v1815_v49 = vpack.c.bf16 %v1156_v37, %v1155_v33  ;;  %v1022_v51 = vmul.f32 %v2210_v40, %v745_v42  ;;  %v1945_v52 = vpop.f32.mrf.mxu0  ;;  %v1977_v53 = vpop.f32.mrf.mxu1  ;;  %v1063_v56 = vadd.f32 %v2217_v45, %v992_v38  ;;  %v1095_v57 = vadd.f32 %v2217_v45, %v1024_v39 }
 0x11f   :  { %v1730_v54 = vpack.c.bf16 %v1122_v46, %v1121_v43  ;;  %v1810_v55 = vpack.c.bf16 %v1154_v47, %v1153_v44  ;;  %1839 = vst [vmem:[#allocation3 + $0x68] sm:$0xff] %v1735_v48   ;;  %v993_v58 = vmul.f32 %v1945_v52, %v2210_v40  ;;  %v1025_v59 = vmul.f32 %v1977_v53, %v2210_v40 }
 0x120   :  { %1855 = vst [vmem:[#allocation3 + $0xe8] sm:$0xff] %v1815_v49   ;;  %v620_v60 = vpop.f32.mrf.mxu0  ;;  %v748_v61 = vpop.f32.mrf.mxu1  ;;  %v1061_v62 = vadd.f32 %v2217_v45, %v990_v50  ;;  %v1093_v63 = vadd.f32 %v2217_v45, %v1022_v51  ;;  %v1127_v6 = vmax.f32 %v1063_v56, 0.0  ;;  %v1159_v7 = vmax.f32 %v1095_v57, 0.0 }
 0x121   :  { %1838 = vst [vmem:[#allocation3 + $0x60] sm:$0xff] %v1730_v54   ;;  %1854 = vst [vmem:[#allocation3 + $0xe0] sm:$0xff] %v1810_v55   ;;  %v991_v0 = vmul.f32 %v2210_v40, %v620_v60  ;;  %v1023_v1 = vmul.f32 %v2210_v40, %v748_v61  ;;  %v1064_v2 = vadd.f32 %v2217_v45, %v993_v58 }
 0x122   :  { %v1096_v3 = vadd.f32 %v2217_v45, %v1025_v59  ;;  %v1125_v10 = vmax.f32 %v1061_v62, 0.0  ;;  %v1157_v11 = vmax.f32 %v1093_v63, 0.0 }
 0x123   :  { %v1062_v4 = vadd.f32 %v2217_v45, %v991_v0  ;;  %v1094_v5 = vadd.f32 %v2217_v45, %v1023_v1  ;;  %v1128_v8 = vmax.f32 %v1064_v2, 0.0 }
 0x124   :  { %v1160_v9 = vmax.f32 %v1096_v3, 0.0 }
 0x125   :  { %v1126_v12 = vmax.f32 %v1062_v4, 0.0  ;;  %v1158_v13 = vmax.f32 %v1094_v5, 0.0  ;;  %v1745_v14 = vpack.c.bf16 %v1128_v8, %v1127_v6 }
 0x126   :  { %v1825_v40 = vpack.c.bf16 %v1160_v9, %v1159_v7 }
 0x127   :  { %v1740_v15 = vpack.c.bf16 %v1126_v12, %v1125_v10  ;;  %v1820_v16 = vpack.c.bf16 %v1158_v13, %v1157_v11  ;;  %1841 = vst [vmem:[#allocation3 + $0x78] sm:$0xff] %v1745_v14  }
 0x128   :  { %1857 = vst [vmem:[#allocation3 + $0xf8] sm:$0xff] %v1825_v40  }
 0x129   :  { %1840 = vst [vmem:[#allocation3 + $0x70] sm:$0xff] %v1740_v15   ;;  %1856 = vst [vmem:[#allocation3 + $0xf0] sm:$0xff] %v1820_v16  }
 0x12a   :  { %2048 = shalt.err (!%p2045_p4)
}
 0x12b   :  { %s2060_s18 = smov 64   ;;  %s2061_s19 = smov 4  }
 0x12c   :  { %1492 = dma.vmem_to_hbm [thread:$0]  %s1487_s2, 4096, %s2352_s4, [#allocation4], %s2060_s18, %s2060_s18, %s2061_s19  }
 0x12d   :  { %2057 = dma.done.wait [#allocation4], 4096  }
 0x12e   :  { %2058 = vsyncadd [#allocation4], 4294963200 }
 0x12f   :  { %1496 = vsyncpa [#allocation4], 1 }

</bundles_post_ra>
